<compile_context>
chip_gen: v5e
topology: v5e:2x2
jax: 0.10.0
libtpu: 0.0.40
codegen_flags: <defaults>
</compile_context>

<pallas_src>
import functools

import jax
import jax.numpy as jnp
from jax.experimental import pallas as pl
from jax.experimental.pallas import tpu as pltpu

IMAGENET_DEFAULT_MEAN = (0.485, 0.456, 0.406)
IMAGENET_DEFAULT_STD = (0.229, 0.224, 0.225)

_NEG = -1e30  # "minus infinity" for padded classes / label masking


def _round_up(x, m):
    return (x + m - 1) // m * m


def _vmem_capacity_bytes():
    """Physical VMEM per TensorCore; conservative (v7x) fallback."""
    try:
        return int(pltpu.get_tpu_info().vmem_capacity_bytes)
    except Exception:  # pragma: no cover - interpret mode / older jax
        return 64 * 1024 * 1024


def _pick_tk(d, cap):
    """Largest K tile <= cap; prefer a divisor of d (no x/W padding tail)."""
    if d <= cap:
        return _round_up(d, 128)
    for cand in range(cap, cap // 2 - 1, -128):
        if d % cand == 0:
            return cand
    return cap  # pad the K tail with zeros (scale/shift = 0 there)


def _train_kernel(x_ref, scale_ref, shift_ref, w_ref, b_ref, labels_ref,
                  out_ref, acc_ref, *, topk):
    """One (B-tile, K-tile) step.

    x_ref:      (TB, TK)   uint8    raw pixels, NCHW-flattened, zero-padded
    scale_ref:  (1, TK)    float32  1/(255*std[channel])   (0 on pad columns)
    shift_ref:  (1, TK)    float32  mean[channel]/std[channel]  (0 on pad)
    w_ref:      (TK, CP)   bfloat16 row-permuted weights (NCHW row order)
    b_ref:      (1, CP)    float32  bias (-1e30 on pad classes)
    labels_ref: (TB, 1)    int32
    out_ref:    (TB, 128)  float32  lane 0 = per-ex loss, 1 = acc1, 2 = acc5
    acc_ref:    (TB, CP)   float32  VMEM logits accumulator
    """
    k = pl.program_id(1)

    @pl.when(k == 0)
    def _():
        acc_ref[...] = jnp.zeros_like(acc_ref)

    # In-kernel normalization of the raw uint8 pixels (VPU work, hidden under
    # the dominant weight DMA):  x_norm = x/255/std - mean/std = x*scale-shift.
    x = x_ref[...].astype(jnp.float32)
    x_norm = (x * scale_ref[...] - shift_ref[...]).astype(jnp.bfloat16)
    # MXU matmul, bf16 operands, f32 accumulation.
    acc_ref[...] += jnp.dot(x_norm, w_ref[...],
                            preferred_element_type=jnp.float32)

    @pl.when(k == pl.num_programs(1) - 1)
    def _():
        logits = acc_ref[...] + b_ref[...]            # (TB, CP); pad cols ~ -1e30
        labels = labels_ref[...]                      # (TB, 1) int32

        # stable log-softmax cross-entropy
        m = jnp.max(logits, axis=-1, keepdims=True)
        lse = m + jnp.log(jnp.sum(jnp.exp(logits - m), axis=-1, keepdims=True))
        cls_ids = jax.lax.broadcasted_iota(jnp.int32, logits.shape, 1)
        label_logit = jnp.max(jnp.where(cls_ids == labels, logits, _NEG),
                              axis=-1, keepdims=True)
        per_ex_loss = lse - label_logit               # (TB, 1)

        # top-k accuracy via rank of the label logit.
        # TODO(synk): strict '>' ranking can differ from torch.topk on exact ties.
        rank = jnp.sum((logits > label_logit).astype(jnp.float32),
                       axis=-1, keepdims=True)
        acc1 = (rank < 1.0).astype(jnp.float32)
        acc5 = (rank < float(topk)).astype(jnp.float32)

        # single unmasked lane-dense store of the metrics slab
        lane = jax.lax.broadcasted_iota(jnp.int32, out_ref.shape, 1)
        out_ref[...] = jnp.where(
            lane == 0, per_ex_loss,
            jnp.where(lane == 1, acc1, jnp.where(lane == 2, acc5, 0.0)))


@functools.partial(jax.jit, static_argnames=("num_classes",))
def torch_train_module_forward(images_nchw_u8, labels, w, b, num_classes):
    """Replicates TorchTrainModule.forward (criterion='ce', deterministic=True).

    images_nchw_u8: (B, 3, H, W) raw uint8 pixels (pre_normalized=False path).
    w, b: linear classifier params defined on the NHWC-flattened image
          ((h,w,c) row order), shapes (3*H*W, num_classes), (num_classes,).
    """
    B, C_img, H, W = images_nchw_u8.shape
    assert C_img == 3, "ImageNet normalization assumes 3 channels"
    D = C_img * H * W

    # --- generation-aware tiling --------------------------------------------
    big_vmem = _vmem_capacity_bytes() >= 100 * 1024 * 1024  # v5e/v6e: 128 MiB
    TB_CAP = 1024 if big_vmem else 512          # v7x keeps tiles under 64 MiB
    TK_CAP = 4096 if big_vmem else 2048
    vmem_limit = (96 if big_vmem else 48) * 1024 * 1024

    TB = min(TB_CAP, _round_up(B, 32))          # uint8 sublane tile is 32
    TK = _pick_tk(D, TK_CAP)
    B_pad = _round_up(B, TB)
    D_pad = _round_up(D, TK)
    C_pad = max(128, _round_up(num_classes, 128))
    topk = min(5, num_classes)
    # NOTE: on v7x, batches larger than TB give >=2 batch tiles which the
    # "parallel" grid axis shards across the two TensorCores.

    # --- wrapper glue (kept to a minimum of HBM passes) ----------------------
    # Images stay in NCHW-flatten order (reshape = free, no transpose pass);
    # the (h,w,c)->(c,h,w) row permutation is folded into W instead.
    x_flat = images_nchw_u8.astype(jnp.uint8).reshape(B, D)
    if B_pad == B and D_pad == D:
        x_in = x_flat                                        # no pad copy
    else:
        x_in = jnp.zeros((B_pad, D_pad), jnp.uint8).at[:B, :D].set(x_flat)

    # Per-feature normalization constants in NCHW row order (channel-major).
    mean = jnp.asarray(IMAGENET_DEFAULT_MEAN, jnp.float32)
    std = jnp.asarray(IMAGENET_DEFAULT_STD, jnp.float32)
    scale_nchw = jnp.repeat(1.0 / (255.0 * std), H * W)       # (D,)
    shift_nchw = jnp.repeat(mean / std, H * W)                # (D,)
    scale_row = jnp.zeros((1, D_pad), jnp.float32).at[0, :D].set(scale_nchw)
    shift_row = jnp.zeros((1, D_pad), jnp.float32).at[0, :D].set(shift_nchw)

    # Weights: permute rows from NHWC-flatten to NCHW-flatten order, cast to
    # bf16 (single pass, fused with padding).  In a real training loop the
    # model would hold W directly in this layout.
    w_nchw = jnp.transpose(w.reshape(H * W, C_img, num_classes),
                           (1, 0, 2)).reshape(D, num_classes)
    w_bf = w_nchw.astype(jnp.bfloat16)
    if D_pad == D and C_pad == num_classes:
        w_in = w_bf
    else:
        w_in = (jnp.zeros((D_pad, C_pad), jnp.bfloat16)
                .at[:D, :num_classes].set(w_bf))

    b_row = (jnp.full((1, C_pad), _NEG, jnp.float32)
             .at[0, :num_classes].set(b.astype(jnp.float32)))
    labels_col = (jnp.zeros((B_pad, 1), jnp.int32)
                  .at[:B, 0].set(labels.astype(jnp.int32)))

    grid = (B_pad // TB, D_pad // TK)
    nb = grid[0]

    cost = pl.CostEstimate(
        flops=2 * B_pad * D_pad * C_pad,
        transcendentals=B_pad * (C_pad + 1),
        bytes_accessed=(B_pad * D_pad                        # uint8 pixels
                        + nb * D_pad * C_pad * 2             # bf16 W / B-tile
                        + nb * D_pad * 4 * 2                 # scale + shift
                        + B_pad * 4 + C_pad * 4
                        + B_pad * 128 * 4),
    )

    slab = pl.pallas_call(
        functools.partial(_train_kernel, topk=topk),
        out_shape=jax.ShapeDtypeStruct((B_pad, 128), jnp.float32),
        grid_spec=pltpu.PrefetchScalarGridSpec(
            num_scalar_prefetch=0,
            grid=grid,
            in_specs=[
                pl.BlockSpec((TB, TK), lambda i, k: (i, k)),       # x (uint8)
                pl.BlockSpec((1, TK), lambda i, k: (0, k)),        # scale
                pl.BlockSpec((1, TK), lambda i, k: (0, k)),        # shift
                pl.BlockSpec((TK, C_pad), lambda i, k: (k, 0)),    # W (bf16)
                pl.BlockSpec((1, C_pad), lambda i, k: (0, 0)),     # b
                pl.BlockSpec((TB, 1), lambda i, k: (i, 0)),        # labels
            ],
            out_specs=pl.BlockSpec((TB, 128), lambda i, k: (i, 0)),
            scratch_shapes=[pltpu.VMEM((TB, C_pad), jnp.float32)],
        ),
        compiler_params=pltpu.CompilerParams(
            dimension_semantics=("parallel", "arbitrary"),
            vmem_limit_bytes=vmem_limit,
        ),
        cost_estimate=cost,
    )(x_in, scale_row, shift_row, w_in, b_row, labels_col)

    # Matches the PyTorch module: scalar mean loss, per-example acc1/acc5.
    per_ex_loss = slab[:B, 0]
    metrics = {"loss": jnp.mean(per_ex_loss), "acc1": slab[:B, 1]}
    if num_classes > 5:
        metrics["acc5"] = slab[:B, 2]
    return metrics


if __name__ == "__main__":
    # Small shapes consistent with the forward pass: NCHW uint8 images,
    # 3 channels (ImageNet normalization), integer class labels.
    B, C, H, W = 8, 3, 16, 16
    NUM_CLASSES = 10

    key = jax.random.PRNGKey(0)
    k_img, k_lbl, k_w, k_b = jax.random.split(key, 4)

    images = jax.random.randint(k_img, (B, C, H, W), 0, 256,
                                dtype=jnp.int32).astype(jnp.uint8)
    labels = jax.random.randint(k_lbl, (B,), 0, NUM_CLASSES, dtype=jnp.int32)

    D = H * W * C
    w = (jax.random.normal(k_w, (D, NUM_CLASSES), dtype=jnp.float32)
         * (1.0 / jnp.sqrt(D)))
    b = jax.random.normal(k_b, (NUM_CLASSES,), dtype=jnp.float32) * 0.01

    metrics = torch_train_module_forward(images, labels, w, b, NUM_CLASSES)
    metrics = jax.block_until_ready(metrics)

    assert metrics["loss"].shape == ()
    assert metrics["acc1"].shape == (B,)
    assert metrics["acc5"].shape == (B,)
    assert bool(jnp.isfinite(metrics["loss"]))
    assert bool(jnp.all(jnp.isfinite(metrics["acc1"])))
    print("KERNEL_OK")
</pallas_src>

<mosaic_0001>
module attributes {stable_mosaic.version = 11 : i64} {
  func.func @_train_kernel(%arg0: i32, %arg1: i32, %arg2: memref<32x768xi8, #tpu.memory_space<vmem>>, %arg3: memref<1x768xf32, #tpu.memory_space<vmem>>, %arg4: memref<1x768xf32, #tpu.memory_space<vmem>>, %arg5: memref<768x128xbf16, #tpu.memory_space<vmem>>, %arg6: memref<1x128xf32, #tpu.memory_space<vmem>>, %arg7: memref<32x1xi32, #tpu.memory_space<vmem>>, %arg8: memref<32x128xf32, #tpu.memory_space<vmem>>, %arg9: memref<32x128xf32, #tpu.memory_space<vmem>>) attributes {dimension_semantics = [#tpu.dimension_semantics<parallel>, #tpu.dimension_semantics<arbitrary>], iteration_bounds = array<i64: 1, 1>, scalar_prefetch = 0 : i64, scratch_operands = 1 : i64, tpu.core_type = #tpu.core_type<tc>, window_params = [{transform_indices = @transform_0, window_bounds = array<i64: 32, 768>}, {transform_indices = @transform_1, window_bounds = array<i64: 1, 768>}, {transform_indices = @transform_2, window_bounds = array<i64: 1, 768>}, {transform_indices = @transform_3, window_bounds = array<i64: 768, 128>}, {pipeline_mode = #tpu.pipeline_mode<synchronous>, transform_indices = @transform_4, window_bounds = array<i64: 1, 128>}, {transform_indices = @transform_5, window_bounds = array<i64: 32, 1>}, {transform_indices = @transform_6, window_bounds = array<i64: 32, 128>}]} {
    %c0_i32 = arith.constant 0 : i32
    %0 = arith.cmpi eq, %arg1, %c0_i32 : i32
    %1 = arith.extui %0 : i1 to i32
    %c0_i32_0 = arith.constant 0 : i32
    %2 = arith.cmpi ne, %1, %c0_i32_0 : i32
    scf.if %2 {
      %cst_14 = arith.constant 0.000000e+00 : f32
      %20 = vector.broadcast %cst_14 : f32 to vector<32x128xf32>
      %c0_15 = arith.constant 0 : index
      %c0_16 = arith.constant 0 : index
      %21 = vector.load %arg9[%c0_15, %c0_16] : memref<32x128xf32, #tpu.memory_space<vmem>>, vector<32x128xf32>
      tpu.vector_store %arg9[%c0_15, %c0_16], %20 {strides = array<i32>} : memref<32x128xf32, #tpu.memory_space<vmem>>, vector<32x128xf32>,
    } else {
    }
    %c0 = arith.constant 0 : index
    %c0_1 = arith.constant 0 : index
    %3 = vector.load %arg2[%c0, %c0_1] : memref<32x768xi8, #tpu.memory_space<vmem>>, vector<32x768xi8>
    %4 = arith.uitofp %3 : vector<32x768xi8> to vector<32x768xf32>
    %c0_2 = arith.constant 0 : index
    %c0_3 = arith.constant 0 : index
    %5 = vector.load %arg3[%c0_2, %c0_3] : memref<1x768xf32, #tpu.memory_space<vmem>>, vector<1x768xf32>
    %6 = vector.broadcast %5 : vector<1x768xf32> to vector<32x768xf32>
    %7 = arith.mulf %4, %6 : vector<32x768xf32>
    %c0_4 = arith.constant 0 : index
    %c0_5 = arith.constant 0 : index
    %8 = vector.load %arg4[%c0_4, %c0_5] : memref<1x768xf32, #tpu.memory_space<vmem>>, vector<1x768xf32>
    %9 = vector.broadcast %8 : vector<1x768xf32> to vector<32x768xf32>
    %10 = arith.subf %7, %9 : vector<32x768xf32>
    %11 = arith.truncf %10 : vector<32x768xf32> to vector<32x768xbf16>
    %c0_6 = arith.constant 0 : index
    %c0_7 = arith.constant 0 : index
    %12 = vector.load %arg9[%c0_6, %c0_7] : memref<32x128xf32, #tpu.memory_space<vmem>>, vector<32x128xf32>
    %c0_8 = arith.constant 0 : index
    %c0_9 = arith.constant 0 : index
    %13 = vector.load %arg5[%c0_8, %c0_9] : memref<768x128xbf16, #tpu.memory_space<vmem>>, vector<768x128xbf16>
    %cst = arith.constant dense<0.000000e+00> : vector<32x128xf32>
    %14 = tpu.matmul %11, %13, %cst {dimension_numbers = #tpu.dot_dimension_numbers<[1], [0], [0], [1], [0, 0, 1, 1], [], []>} : vector<32x768xbf16>, vector<768x128xbf16>, vector<32x128xf32> -> vector<32x128xf32>
    %15 = arith.addf %12, %14 : vector<32x128xf32>
    %c0_10 = arith.constant 0 : index
    %c0_11 = arith.constant 0 : index
    %16 = vector.load %arg9[%c0_10, %c0_11] : memref<32x128xf32, #tpu.memory_space<vmem>>, vector<32x128xf32>
    tpu.vector_store %arg9[%c0_10, %c0_11], %15 {strides = array<i32>} : memref<32x128xf32, #tpu.memory_space<vmem>>, vector<32x128xf32>,
    %c0_i32_12 = arith.constant 0 : i32
    %17 = arith.cmpi eq, %arg1, %c0_i32_12 : i32
    %18 = arith.extui %17 : i1 to i32
    %c0_i32_13 = arith.constant 0 : i32
    %19 = arith.cmpi ne, %18, %c0_i32_13 : i32
    scf.if %19 {
      %c0_14 = arith.constant 0 : index
      %c0_15 = arith.constant 0 : index
      %20 = vector.load %arg9[%c0_14, %c0_15] : memref<32x128xf32, #tpu.memory_space<vmem>>, vector<32x128xf32>
      %c0_16 = arith.constant 0 : index
      %c0_17 = arith.constant 0 : index
      %21 = vector.load %arg6[%c0_16, %c0_17] : memref<1x128xf32, #tpu.memory_space<vmem>>, vector<1x128xf32>
      %22 = vector.broadcast %21 : vector<1x128xf32> to vector<32x128xf32>
      %23 = arith.addf %20, %22 : vector<32x128xf32>
      %c0_18 = arith.constant 0 : index
      %c0_19 = arith.constant 0 : index
      %24 = vector.load %arg7[%c0_18, %c0_19] : memref<32x1xi32, #tpu.memory_space<vmem>>, vector<32x1xi32>
      %cst_20 = arith.constant dense<0xFF800000> : vector<32xf32>
      %25 = vector.multi_reduction <maximumf>, %23, %cst_20 [1] : vector<32x128xf32> to vector<32xf32>
      %26 = vector.shape_cast %25 : vector<32xf32> to vector<32x1xf32>
      %27 = vector.broadcast %26 : vector<32x1xf32> to vector<32x128xf32>
      %28 = arith.subf %23, %27 : vector<32x128xf32>
      %29 = math.exp %28 : vector<32x128xf32>
      %cst_21 = arith.constant dense<0.000000e+00> : vector<32xf32>
      %30 = vector.multi_reduction <add>, %29, %cst_21 [1] : vector<32x128xf32> to vector<32xf32>
      %31 = vector.shape_cast %30 : vector<32xf32> to vector<32x1xf32>
      %32 = math.log %31 : vector<32x1xf32>
      %33 = arith.addf %26, %32 : vector<32x1xf32>
      %34 = tpu.iota {dimensions = array<i32: 1>} : vector<32x128xi32>
      %35 = vector.broadcast %24 : vector<32x1xi32> to vector<32x128xi32>
      %36 = arith.cmpi eq, %34, %35 : vector<32x128xi32>
      %cst_22 = arith.constant -1.000000e+30 : f32
      %37 = vector.broadcast %cst_22 : f32 to vector<32x128xf32>
      %38 = arith.select %36, %23, %37 : vector<32x128xi1>, vector<32x128xf32>
      %cst_23 = arith.constant dense<0xFF800000> : vector<32xf32>
      %39 = vector.multi_reduction <maximumf>, %38, %cst_23 [1] : vector<32x128xf32> to vector<32xf32>
      %40 = vector.shape_cast %39 : vector<32xf32> to vector<32x1xf32>
      %41 = arith.subf %33, %40 : vector<32x1xf32>
      %42 = vector.broadcast %40 : vector<32x1xf32> to vector<32x128xf32>
      %43 = arith.cmpf ogt, %23, %42 : vector<32x128xf32>
      %44 = arith.extui %43 : vector<32x128xi1> to vector<32x128xi32>
      %45 = arith.sitofp %44 : vector<32x128xi32> to vector<32x128xf32>
      %cst_24 = arith.constant dense<0.000000e+00> : vector<32xf32>
      %46 = vector.multi_reduction <add>, %45, %cst_24 [1] : vector<32x128xf32> to vector<32xf32>
      %47 = vector.shape_cast %46 : vector<32xf32> to vector<32x1xf32>
      %cst_25 = arith.constant 1.000000e+00 : f32
      %48 = vector.broadcast %cst_25 : f32 to vector<32x1xf32>
      %49 = arith.cmpf olt, %47, %48 : vector<32x1xf32>
      %50 = arith.extui %49 : vector<32x1xi1> to vector<32x1xi32>
      %51 = arith.sitofp %50 : vector<32x1xi32> to vector<32x1xf32>
      %cst_26 = arith.constant 5.000000e+00 : f32
      %52 = vector.broadcast %cst_26 : f32 to vector<32x1xf32>
      %53 = arith.cmpf olt, %47, %52 : vector<32x1xf32>
      %54 = arith.extui %53 : vector<32x1xi1> to vector<32x1xi32>
      %55 = arith.sitofp %54 : vector<32x1xi32> to vector<32x1xf32>
      %56 = tpu.iota {dimensions = array<i32: 1>} : vector<32x128xi32>
      %c0_i32_27 = arith.constant 0 : i32
      %57 = vector.broadcast %c0_i32_27 : i32 to vector<32x128xi32>
      %58 = arith.cmpi eq, %56, %57 : vector<32x128xi32>
      %c1_i32 = arith.constant 1 : i32
      %59 = vector.broadcast %c1_i32 : i32 to vector<32x128xi32>
      %60 = arith.cmpi eq, %56, %59 : vector<32x128xi32>
      %c2_i32 = arith.constant 2 : i32
      %61 = vector.broadcast %c2_i32 : i32 to vector<32x128xi32>
      %62 = arith.cmpi eq, %56, %61 : vector<32x128xi32>
      %cst_28 = arith.constant 0.000000e+00 : f32
      %63 = vector.shape_cast %55 : vector<32x1xf32> to vector<32x1xf32>
      %64 = vector.broadcast %63 : vector<32x1xf32> to vector<32x128xf32>
      %65 = vector.broadcast %cst_28 : f32 to vector<32x128xf32>
      %66 = arith.select %62, %64, %65 : vector<32x128xi1>, vector<32x128xf32>
      %67 = vector.shape_cast %51 : vector<32x1xf32> to vector<32x1xf32>
      %68 = vector.broadcast %67 : vector<32x1xf32> to vector<32x128xf32>
      %69 = arith.select %60, %68, %66 : vector<32x128xi1>, vector<32x128xf32>
      %70 = vector.shape_cast %41 : vector<32x1xf32> to vector<32x1xf32>
      %71 = vector.broadcast %70 : vector<32x1xf32> to vector<32x128xf32>
      %72 = arith.select %58, %71, %69 : vector<32x128xi1>, vector<32x128xf32>
      %c0_29 = arith.constant 0 : index
      %c0_30 = arith.constant 0 : index
      %73 = vector.load %arg8[%c0_29, %c0_30] : memref<32x128xf32, #tpu.memory_space<vmem>>, vector<32x128xf32>
      tpu.vector_store %arg8[%c0_29, %c0_30], %72 {strides = array<i32>} : memref<32x128xf32, #tpu.memory_space<vmem>>, vector<32x128xf32>,
    } else {
    }
    return
  }
  func.func @transform_0(%arg0: i32, %arg1: i32) -> (i32, i32) {
    %c0_i32 = arith.constant 0 : i32
    return %arg0, %arg1 : i32, i32
  }
  func.func @transform_1(%arg0: i32, %arg1: i32) -> (i32, i32) {
    %c0_i32 = arith.constant 0 : i32
    %c0_i32_0 = arith.constant 0 : i32
    return %c0_i32, %arg1 : i32, i32
  }
  func.func @transform_2(%arg0: i32, %arg1: i32) -> (i32, i32) {
    %c0_i32 = arith.constant 0 : i32
    %c0_i32_0 = arith.constant 0 : i32
    return %c0_i32, %arg1 : i32, i32
  }
  func.func @transform_3(%arg0: i32, %arg1: i32) -> (i32, i32) {
    %c0_i32 = arith.constant 0 : i32
    %c0_i32_0 = arith.constant 0 : i32
    return %arg1, %c0_i32 : i32, i32
  }
  func.func @transform_4(%arg0: i32, %arg1: i32) -> (i32, i32) {
    %c0_i32 = arith.constant 0 : i32
    %c0_i32_0 = arith.constant 0 : i32
    %c0_i32_1 = arith.constant 0 : i32
    return %c0_i32, %c0_i32_0 : i32, i32
  }
  func.func @transform_5(%arg0: i32, %arg1: i32) -> (i32, i32) {
    %c0_i32 = arith.constant 0 : i32
    %c0_i32_0 = arith.constant 0 : i32
    return %arg0, %c0_i32 : i32, i32
  }
  func.func @transform_6(%arg0: i32, %arg1: i32) -> (i32, i32) {
    %c0_i32 = arith.constant 0 : i32
    %c0_i32_0 = arith.constant 0 : i32
    return %arg0, %c0_i32 : i32, i32
  }
}

</mosaic_0001>

<bundles_post_ra>
// kernel: torch_train_module_forward.1
= control target key start
LH: loop header
LB: loop body
LE: loop exit
PB: predicated region body
PF: predicated region fallthrough
CT: control target
= control target key end

     0   :  { %s1549_s3 = inlined_call_operand.vmem [shape: bf16[768,128], index: 3, kind: input, shape index: {}]   ;;  %s1550_s0 = inlined_call_operand.vmem [shape: u8[32,768], index: 0, kind: input, shape index: {}]   ;;  %s1551_s1 = inlined_call_operand.vmem [shape: f32[1,768], index: 1, kind: input, shape index: {}]   ;;  %s1552_s2 = inlined_call_operand.vmem [shape: f32[1,768], index: 2, kind: input, shape index: {}]   ;;  %s1553_s5 = inlined_call_operand.vmem [shape: s32[32,1], index: 5, kind: input, shape index: {}]   ;;  %s1554_s4 = inlined_call_operand.vmem [shape: f32[1,128], index: 4, kind: input, shape index: {}]   ;;  %s1555_s6 = inlined_call_operand.vmem [shape: f32[32,128], index: 6, kind: output, shape index: {}]  }
   0x1   :  { %v1078_v0 = vld [vmem:[%s1549_s3 + $0x38] sm:$0xff]  ;;  %v1077_v4 = vld [vmem:[%s1549_s3 + $0x30] sm:$0xff]  ;;  %v1076_v8 = vld [vmem:[%s1549_s3 + $0x28] sm:$0xff] }
   0x2   :  { %v1086_v1 = vld [vmem:[%s1549_s3 + $0x78] sm:$0xff]  ;;  %585 = vmatpush.bf16.msra.mxu0 %v1078_v0  ;;  %v1085_v5 = vld [vmem:[%s1549_s3 + $0x70] sm:$0xff]  ;;  %v1084_v9 = vld [vmem:[%s1549_s3 + $0x68] sm:$0xff] }
   0x3   :  { %v1094_v2 = vld [vmem:[%s1549_s3 + $0xb8] sm:$0xff]  ;;  %604 = vmatpush.bf16.msra.mxu1 %v1086_v1  ;;  %v1093_v6 = vld [vmem:[%s1549_s3 + $0xb0] sm:$0xff]  ;;  %v1092_v10 = vld [vmem:[%s1549_s3 + $0xa8] sm:$0xff] }
   0x4   :  { %v1102_v3 = vld [vmem:[%s1549_s3 + $0xf8] sm:$0xff]  ;;  %623 = vmatpush.bf16.msra.mxu2 %v1094_v2  ;;  %v1101_v7 = vld [vmem:[%s1549_s3 + $0xf0] sm:$0xff]  ;;  %v1100_v11 = vld [vmem:[%s1549_s3 + $0xe8] sm:$0xff] }
   0x5   :  { %642 = vmatpush.bf16.msra.mxu3 %v1102_v3  ;;  %v1075_v12 = vld [vmem:[%s1549_s3 + $0x20] sm:$0xff]  ;;  %v1251_v19 = vld [vmem:[%s1550_s0 + $0x8] sm:$0xff]  ;;  %v1263_v23 = vld [vmem:[%s1550_s0 + $0x10] sm:$0xff] }
   0x6   :  { %586 = vmatpush.bf16.msra.mxu0 %v1077_v4  ;;  %v1083_v13 = vld [vmem:[%s1549_s3 + $0x60] sm:$0xff]  ;;  %v38_v21 = vunpack.c.0.s8 %v1251_v19  ;;  %v44_v22 = vunpack.c.1.s8 %v1251_v19  ;;  %v1074_v26 = vld [vmem:[%s1549_s3 + $0x18] sm:$0xff]  ;;  %v39_v30 = vunpack.c.0.s8 %v1263_v23  ;;  %v45_v31 = vunpack.c.1.s8 %v1263_v23  ;;  %v1073_v46 = vld [vmem:[%s1549_s3 + $0x10] sm:$0xff] }
   0x7   :  { %605 = vmatpush.bf16.msra.mxu1 %v1085_v5  ;;  %v1238_v14 = vld [vmem:[%s1550_s0] sm:$0xff]  ;;  %v1082_v27 = vld [vmem:[%s1549_s3 + $0x58] sm:$0xff]  ;;  %v1081_v47 = vld [vmem:[%s1549_s3 + $0x50] sm:$0xff] }
   0x8   :  { %624 = vmatpush.bf16.msra.mxu2 %v1093_v6  ;;  %v1091_v15 = vld [vmem:[%s1549_s3 + $0xa0] sm:$0xff]  ;;  %v37_v17 = vunpack.c.0.s8 %v1238_v14  ;;  %v43_v18 = vunpack.c.1.s8 %v1238_v14  ;;  %v62_v28 = vand.u32 255, %v38_v21  ;;  %v68_v29 = vand.u32 255, %v44_v22  ;;  %v1276_v32 = vld [vmem:[%s1550_s0 + $0x18] sm:$0xff]  ;;  %v1089_v51 = vld [vmem:[%s1549_s3 + $0x90] sm:$0xff] }
   0x9   :  { %643 = vmatpush.bf16.msra.mxu3 %v1101_v7  ;;  %v1099_v16 = vld [vmem:[%s1549_s3 + $0xe0] sm:$0xff]  ;;  %v1090_v33 = vld [vmem:[%s1549_s3 + $0x98] sm:$0xff]  ;;  %v63_v41 = vand.u32 255, %v39_v30  ;;  %v69_v42 = vand.u32 255, %v45_v31  ;;  %v40_v44 = vunpack.c.0.s8 %v1276_v32  ;;  %v46_v45 = vunpack.c.1.s8 %v1276_v32  ;;  %v1097_v52 = vld [vmem:[%s1549_s3 + $0xd0] sm:$0xff] }
   0xa   :  { %587 = vmatpush.bf16.msra.mxu0 %v1076_v8  ;;  %v1256_v20 = vld [vmem:[%s1551_s1] sm:$0x3f]  ;;  %v61_v24 = vand.u32 255, %v37_v17  ;;  %v67_v25 = vand.u32 255, %v43_v18  ;;  %v1098_v34 = vld [vmem:[%s1549_s3 + $0xd8] sm:$0xff]  ;;  %v86_v40 = vcvt.s32.f32 %v62_v28  ;;  %v92_v43 = vcvt.s32.f32 %v68_v29  ;;  %v1072_v0 = vld [vmem:[%s1549_s3 + $0x8] sm:$0xff] }
   0xb   :  { %606 = vmatpush.bf16.msra.mxu1 %v1084_v9  ;;  %v1285_v36 = vperm.slane %v1256_v20, 0  ;;  %v1288_v37 = vperm.slane %v1256_v20, 1  ;;  %v1293_v39 = vld [vmem:[%s1552_s2] sm:$0x3f]  ;;  %v87_v48 = vcvt.s32.f32 %v63_v41  ;;  %v93_v49 = vcvt.s32.f32 %v69_v42  ;;  %v1080_v1 = vld [vmem:[%s1549_s3 + $0x48] sm:$0xff] }
   0xc   :  { %625 = vmatpush.bf16.msra.mxu2 %v1092_v10  ;;  %v85_v35 = vcvt.s32.f32 %v61_v24  ;;  %v91_v38 = vcvt.s32.f32 %v67_v25  ;;  %v1304_v50 = vperm.slane %v1256_v20, 2  ;;  %v1313_v53 = vperm.slane %v1293_v39, 0  ;;  %v1088_v5 = vld [vmem:[%s1549_s3 + $0x88] sm:$0xff]  ;;  %v1071_v22 = vld [vmem:[%s1549_s3] sm:$0xff] }
   0xd   :  { %644 = vmatpush.bf16.msra.mxu3 %v1100_v11  ;;  %v64_v54 = vand.u32 255, %v40_v44  ;;  %v70_v55 = vand.u32 255, %v46_v45  ;;  %v124_v58 = vmul.f32 %v1288_v37, %v86_v40  ;;  %v1319_v59 = vperm.slane %v1293_v39, 1  ;;  %v1096_v6 = vld [vmem:[%s1549_s3 + $0xc8] sm:$0xff]  ;;  %v1118_v44 = vld [vmem:[%s1549_s3 + $0x178] sm:$0xff] }
   0xe   :  { %588 = vmatpush.bf16.msra.mxu0 %v1075_v12  ;;  %v123_v56 = vmul.f32 %v1285_v36, %v85_v35  ;;  %v129_v57 = vmul.f32 %v1285_v36, %v91_v38  ;;  %v130_v60 = vmul.f32 %v1288_v37, %v92_v43  ;;  %v1323_v63 = vperm.slane %v1256_v20, 3 }
   0xf   :  { %607 = vmatpush.bf16.msra.mxu1 %v1083_v13  ;;  %v88_v61 = vcvt.s32.f32 %v64_v54  ;;  %v94_v62 = vcvt.s32.f32 %v70_v55  ;;  %v125_v2 = vmul.f32 %v1304_v50, %v87_v48  ;;  %v131_v3 = vmul.f32 %v1304_v50, %v93_v49 }
  0x10   :  { %626 = vmatpush.bf16.msra.mxu2 %v1091_v15  ;;  %v1334_v4 = vperm.slane %v1293_v39, 2  ;;  %v1345_v9 = vperm.slane %v1293_v39, 3  ;;  %v49_v10 = vunpack.c.2.s8 %v1238_v14  ;;  %v161_v11 = vsub.f32 %v123_v56, %v1313_v53  ;;  %v1117_v56 = vld [vmem:[%s1549_s3 + $0x170] sm:$0xff] }
  0x11   :  { %645 = vmatpush.bf16.msra.mxu3 %v1099_v16  ;;  %v126_v7 = vmul.f32 %v1323_v63, %v88_v61  ;;  %v132_v8 = vmul.f32 %v1323_v63, %v94_v62  ;;  %v55_v12 = vunpack.c.3.s8 %v1238_v14  ;;  %v50_v13 = vunpack.c.2.s8 %v1251_v19  ;;  %v1079_v14 = vld [vmem:[%s1549_s3 + $0x40] sm:$0xff]  ;;  %v1108_v62 = vld [vmem:[%s1549_s3 + $0x128] sm:$0xff] }
  0x12   :  { %589 = vmatpush.bf16.msra.mxu0 %v1074_v26  ;;  %v56_v15 = vunpack.c.3.s8 %v1251_v19  ;;  %v167_v16 = vsub.f32 %v129_v57, %v1313_v53  ;;  %v162_v17 = vsub.f32 %v124_v58, %v1319_v59  ;;  %v168_v18 = vsub.f32 %v130_v60, %v1319_v59  ;;  %v1087_v26 = vld [vmem:[%s1549_s3 + $0x80] sm:$0xff] }
  0x13   :  { %608 = vmatpush.bf16.msra.mxu1 %v1082_v27  ;;  %v51_v21 = vunpack.c.2.s8 %v1263_v23  ;;  %v163_v19 = vsub.f32 %v125_v2, %v1334_v4  ;;  %v169_v24 = vsub.f32 %v131_v3, %v1334_v4  ;;  %v57_v25 = vunpack.c.3.s8 %v1263_v23  ;;  %v1095_v27 = vld [vmem:[%s1549_s3 + $0xc0] sm:$0xff]  ;;  %v1110_v23 = vld [vmem:[%s1549_s3 + $0x138] sm:$0xff] }
  0x14   :  { %627 = vmatpush.bf16.msra.mxu2 %v1090_v33  ;;  %v164_v28 = vsub.f32 %v126_v7, %v1345_v9  ;;  %v170_v29 = vsub.f32 %v132_v8, %v1345_v9  ;;  %v73_v30 = vand.u32 255, %v49_v10  ;;  %v52_v31 = vunpack.c.2.s8 %v1276_v32 }
  0x15   :  { %646 = vmatpush.bf16.msra.mxu3 %v1098_v34  ;;  %v79_v33 = vand.u32 255, %v55_v12  ;;  %v74_v34 = vand.u32 255, %v50_v13  ;;  %v80_v35 = vand.u32 255, %v56_v15  ;;  %v185_v38 = vpack.c.bf16 %v167_v16, %v161_v11  ;;  %v1107_v11 = vld [vmem:[%s1549_s3 + $0x120] sm:$0xff] }
  0x16   :  { %590 = vmatpush.bf16.msra.mxu0 %v1073_v46  ;;  %v186_v40 = vpack.c.bf16 %v168_v18, %v162_v17  ;;  %v75_v41 = vand.u32 255, %v51_v21  ;;  %v58_v42 = vunpack.c.3.s8 %v1276_v32  ;;  %v187_v43 = vpack.c.bf16 %v169_v24, %v163_v19  ;;  %v1109_v32 = vld [vmem:[%s1549_s3 + $0x130] sm:$0xff] }
  0x17   :  { %609 = vmatpush.bf16.msra.mxu1 %v1081_v47  ;;  %v81_v45 = vand.u32 255, %v57_v25  ;;  %v188_v46 = vpack.c.bf16 %v170_v29, %v164_v28  ;;  %v97_v47 = vcvt.s32.f32 %v73_v30  ;;  %v76_v48 = vand.u32 255, %v52_v31  ;;  %v724_v28 = vld [vmem:[%s1553_s5 + $0x10] sm:$0xff]  ;;  %v1106_v29 = vld [vmem:[%s1549_s3 + $0x118] sm:$0xff] }
  0x18   :  { %628 = vmatpush.bf16.msra.mxu2 %v1089_v51  ;;  %v82_v49 = vand.u32 255, %v58_v42  ;;  %v103_v51 = vcvt.s32.f32 %v79_v33  ;;  %v104_v54 = vcvt.s32.f32 %v80_v35  ;;  %v99_v55 = vcvt.s32.f32 %v75_v41  ;;  %v1114_v35 = vld [vmem:[%s1549_s3 + $0x158] sm:$0xff] }
  0x19   :  { %647 = vmatpush.bf16.msra.mxu3 %v1097_v52  ;;  %v98_v52 = vcvt.s32.f32 %v74_v34  ;;  %v105_v57 = vcvt.s32.f32 %v81_v45  ;;  %v135_v58 = vmul.f32 %v1285_v36, %v97_v47  ;;  %v100_v60 = vcvt.s32.f32 %v76_v48 }
  0x1a   :  { %591 = vmatpush.bf16.msra.mxu0 %v1072_v0  ;;  %v106_v61 = vcvt.s32.f32 %v82_v49  ;;  %v141_v0 = vmul.f32 %v1285_v36, %v103_v51  ;;  %v142_v2 = vmul.f32 %v1288_v37, %v104_v54  ;;  %v137_v3 = vmul.f32 %v1304_v50, %v99_v55  ;;  %v36_v36 = vld [vmem:[%s1550_s0 + $0x28] sm:$0xff]  ;;  %v1113_v51 = vld [vmem:[%s1549_s3 + $0x150] sm:$0xff] }
  0x1b   :  { %610 = vmatpush.bf16.msra.mxu1 %v1080_v1  ;;  %v136_v1 = vmul.f32 %v1288_v37, %v98_v52  ;;  %v143_v7 = vmul.f32 %v1304_v50, %v105_v57  ;;  %v173_v37 = vsub.f32 %v135_v58, %v1313_v53  ;;  %v138_v8 = vmul.f32 %v1323_v63, %v100_v60  ;;  %v723_v55 = vld [vmem:[%s1553_s5 + $0x8] sm:$0xff] }
  0x1c   :  { %629 = vmatpush.bf16.msra.mxu2 %v1088_v5  ;;  %v35_v5 = vld [vmem:[%s1550_s0 + $0x20] sm:$0xff]  ;;  %v144_v10 = vmul.f32 %v1323_v63, %v106_v61  ;;  %v179_v12 = vsub.f32 %v141_v0, %v1313_v53  ;;  %v180_v13 = vsub.f32 %v142_v2, %v1319_v59  ;;  %v175_v16 = vsub.f32 %v137_v3, %v1334_v4  ;;  %v1104_v58 = vld [vmem:[%s1549_s3 + $0x108] sm:$0xff] }
  0x1d   :  { %648 = vmatpush.bf16.msra.mxu3 %v1096_v6  ;;  %v1116_v6 = vld [vmem:[%s1549_s3 + $0x168] sm:$0xff]  ;;  %v174_v50 = vsub.f32 %v136_v1, %v1319_v59  ;;  %v41_v15 = vunpack.c.0.s8 %v35_v5  ;;  %v47_v17 = vunpack.c.1.s8 %v35_v5  ;;  %v42_v18 = vunpack.c.0.s8 %v36_v36  ;;  %v1115_v63 = vld [vmem:[%s1549_s3 + $0x160] sm:$0xff] }
  0x1e   :  { %592 = vmatpush.bf16.msra.mxu0 %v1071_v22  ;;  %v48_v21 = vunpack.c.1.s8 %v36_v36  ;;  %v181_v22 = vsub.f32 %v143_v7, %v1334_v4  ;;  %v59_v53 = vunpack.c.3.s8 %v35_v5  ;;  %v722_v59 = vld [vmem:[%s1553_s5] sm:$0xff]  ;;  %v176_v19 = vsub.f32 %v138_v8, %v1345_v9  ;;  %v1112_v3 = vld [vmem:[%s1549_s3 + $0x148] sm:$0xff] }
  0x1f   :  { %611 = vmatpush.bf16.msra.mxu1 %v1079_v14  ;;  %v53_v14 = vunpack.c.2.s8 %v35_v5  ;;  %v182_v24 = vsub.f32 %v144_v10, %v1345_v9  ;;  %v54_v25 = vunpack.c.2.s8 %v36_v36  ;;  %v191_v4 = vpack.c.bf16 %v179_v12, %v173_v37  ;;  %v1103_v37 = vld [vmem:[%s1549_s3 + $0x100] sm:$0xff] }
  0x20   :  { %630 = vmatpush.bf16.msra.mxu2 %v1087_v26  ;;  %v60_v26 = vunpack.c.3.s8 %v36_v36  ;;  %v65_v30 = vand.u32 255, %v41_v15  ;;  %v192_v31 = vpack.c.bf16 %v180_v13, %v174_v50  ;;  %v71_v9 = vand.u32 255, %v47_v17  ;;  %v1111_v12 = vld [vmem:[%s1549_s3 + $0x140] sm:$0xff] }
  0x21   :  { %649 = vmatpush.bf16.msra.mxu3 %v1095_v27  ;;  %593 = vmatmul.bf16.vlgmr.msra.gmra.mxu0 %v185_v38  ;;  %v1156_v27 = vmov 0   ;;  %v72_v33 = vand.u32 255, %v48_v21  ;;  %v193_v34 = vpack.c.bf16 %v181_v22, %v175_v16  ;;  %v77_v38 = vand.u32 255, %v53_v14 }
  0x22   :  { %661 = vmatpush.bf16.msrb.mxu0 %v1110_v23  ;;  %612 = vmatmul.bf16.vlgmr.msra.gmra.mxu1 %v186_v40  ;;  %v83_v40 = vand.u32 255, %v59_v53  ;;  %v194_v41 = vpack.c.bf16 %v182_v24, %v176_v19  ;;  %v78_v42 = vand.u32 255, %v54_v25  ;;  %v89_v45 = vcvt.s32.f32 %v65_v30 }
  0x23   :  { %631 = vmatmul.bf16.vlgmr.msra.gmra.mxu2 %v187_v43  ;;  %680 = vmatpush.bf16.msrb.mxu1 %v1118_v44  ;;  %v84_v43 = vand.u32 255, %v60_v26  ;;  %v95_v47 = vcvt.s32.f32 %v71_v9  ;;  %v96_v49 = vcvt.s32.f32 %v72_v33  ;;  %v101_v52 = vcvt.s32.f32 %v77_v38 }
  0x24   :  { %1119 = vmatpush.bf16.msrb.mxu2 %v1110_v23  ;;  %650 = vmatmul.bf16.vlgmr.msra.gmra.mxu3 %v188_v46  ;;  %v66_v23 = vand.u32 255, %v42_v18  ;;  %v115_v46 = vperm.slane %v1256_v20, 4  ;;  %v107_v54 = vcvt.s32.f32 %v83_v40  ;;  %v153_v61 = vperm.slane %v1293_v39, 4 }
  0x25   :  { %1127 = vmatpush.bf16.msrb.mxu3 %v1118_v44  ;;  %1137 = vset.pattern.permute.xlu0 %v1156_v27  ;;  %v1105_v44 = vld [vmem:[%s1549_s3 + $0x110] sm:$0xff]  ;;  %v108_v57 = vcvt.s32.f32 %v84_v43  ;;  %v154_v2 = vperm.slane %v1293_v39, 5 }
  0x26   :  { %662 = vmatpush.bf16.msrb.mxu0 %v1109_v32  ;;  %1138 = vset.pattern.permute.xlu1 %v1156_v27  ;;  %v90_v48 = vcvt.s32.f32 %v66_v23  ;;  %v127_v60 = vmul.f32 %v115_v46, %v89_v45  ;;  %v139_v5 = vmul.f32 %v115_v46, %v101_v52 }
  0x27   :  { %681 = vmatpush.bf16.msrb.mxu1 %v1117_v56  ;;  %769 = vperm.xlu0 %1137, %v722_v59  }
  0x28   :  { %1120 = vmatpush.bf16.msrb.mxu2 %v1109_v32  ;;  %775 = vperm.xlu1 %1138, %v724_v28   ;;  %v116_v32 = vperm.slane %v1256_v20, 5  ;;  %v725_v20 = vld [vmem:[%s1553_s5 + $0x18] sm:$0xff]  ;;  %v165_v8 = vsub.f32 %v127_v60, %v153_v61  ;;  %v177_v50 = vsub.f32 %v139_v5, %v153_v61 }
  0x29   :  { %1128 = vmatpush.bf16.msrb.mxu3 %v1117_v56  ;;  %v102_v56 = vcvt.s32.f32 %v78_v42 }
  0x2a   :  { %663 = vmatpush.bf16.msrb.mxu0 %v1108_v62  ;;  %v128_v0 = vmul.f32 %v116_v32, %v90_v48  ;;  %v134_v1 = vmul.f32 %v116_v32, %v96_v49  ;;  %v146_v36 = vmul.f32 %v116_v32, %v108_v57 }
  0x2b   :  { %682 = vmatpush.bf16.msrb.mxu1 %v1116_v6  ;;  %v140_v7 = vmul.f32 %v116_v32, %v102_v56 }
  0x2c   :  { %1121 = vmatpush.bf16.msrb.mxu2 %v1108_v62  ;;  %v133_v62 = vmul.f32 %v115_v46, %v95_v47  ;;  %v166_v10 = vsub.f32 %v128_v0, %v154_v2  ;;  %v184_v16 = vsub.f32 %v146_v36, %v154_v2 }
  0x2d   :  { %1129 = vmatpush.bf16.msrb.mxu3 %v1116_v6  ;;  %v145_v6 = vmul.f32 %v115_v46, %v107_v54  ;;  %v178_v15 = vsub.f32 %v140_v7, %v154_v2 }
  0x2e   :  { %664 = vmatpush.bf16.msrb.mxu0 %v1107_v11  ;;  %v171_v39 = vsub.f32 %v133_v62, %v153_v61 }
  0x2f   :  { %683 = vmatpush.bf16.msrb.mxu1 %v1115_v63  ;;  %772 = vperm.xlu0 %1137, %v723_v55   ;;  %v183_v13 = vsub.f32 %v145_v6, %v153_v61  ;;  %v766_v61 = vlaneseq }
  0x30   :  { %1122 = vmatpush.bf16.msrb.mxu2 %v1107_v11  ;;  %778 = vperm.xlu1 %1138, %v725_v20   ;;  %v172_v11 = vsub.f32 %v134_v1, %v154_v2  ;;  %v189_v17 = vpack.c.bf16 %v171_v39, %v165_v8 }
  0x31   :  { %1130 = vmatpush.bf16.msrb.mxu3 %v1115_v63  ;;  %598 = vmatmul.bf16.gmra.mxu0 %v191_v4  ;;  %v195_v21 = vpack.c.bf16 %v183_v13, %v177_v50  ;;  %v196_v63 = vpack.c.bf16 %v184_v16, %v178_v15  ;;  %v1470_v5 = vand.u32 127, %v766_v61 }
  0x32   :  { %665 = vmatpush.bf16.msrb.mxu0 %v1106_v29  ;;  %617 = vmatmul.bf16.gmra.mxu1 %v192_v31  ;;  %v190_v18 = vpack.c.bf16 %v172_v11, %v166_v10 }
  0x33   :  { %636 = vmatmul.bf16.gmra.mxu2 %v193_v34  ;;  %684 = vmatpush.bf16.msrb.mxu1 %v1114_v35  ;;  %vm845_vm8 = vcmp.eq.s32.totalorder %v1470_v5, 1  ;;  %vm846_vm9 = vcmp.eq.s32.totalorder %v1470_v5, 2  ;;  %vm844_vm14 = vcmp.eq.s32.totalorder %v1470_v5, 0 }
  0x34   :  { %1123 = vmatpush.bf16.msrb.mxu2 %v1106_v29  ;;  %655 = vmatmul.bf16.gmra.mxu3 %v194_v41 }
  0x35   :  { %1131 = vmatpush.bf16.msrb.mxu3 %v1114_v35 }
  0x36   :  { %666 = vmatpush.bf16.msrb.mxu0 %v1105_v44 }
  0x37   :  { %685 = vmatpush.bf16.msrb.mxu1 %v1113_v51 }
  0x38   :  { %1124 = vmatpush.bf16.msrb.mxu2 %v1105_v44  ;;  %v1139_v44 = vld [vmem:[%s1554_s4] ss:$0 sm:$0xff] }
  0x39   :  { %1132 = vmatpush.bf16.msrb.mxu3 %v1113_v51 }
  0x3a   :  { %667 = vmatpush.bf16.msrb.mxu0 %v1104_v58 }
  0x3b   :  { %686 = vmatpush.bf16.msrb.mxu1 %v1112_v3 }
  0x3c   :  { %1125 = vmatpush.bf16.msrb.mxu2 %v1104_v58 }
  0x3d   :  { %1133 = vmatpush.bf16.msrb.mxu3 %v1112_v3 }
  0x3e   :  { %668 = vmatpush.bf16.msrb.mxu0 %v1103_v37 }
  0x3f   :  { %687 = vmatpush.bf16.msrb.mxu1 %v1111_v12 }
  0x40   :  { %1126 = vmatpush.bf16.msrb.mxu2 %v1103_v37 }
  0x41   :  { %1134 = vmatpush.bf16.msrb.mxu3 %v1111_v12  ;;  %669 = vmatmul.bf16.vlgmr.msrb.gmra.mxu0 %v189_v17 }
  0x42   :  { %688 = vmatmul.bf16.vlgmr.msrb.gmra.mxu1 %v190_v18 }
  0x43   :  { %674 = vmatmul.bf16.vlgmr.msrb.gmra.mxu2 %v195_v21 }
  0x44   :  { %693 = vmatmul.bf16.vlgmr.msrb.gmra.mxu3 %v196_v63 }
  0x99   :  { %v770_v3 = vpop.permute.xlu0 %769 }
  0x9a   :  { %vm780_vm0 = vcmp.eq.s32.totalorder %v1470_v5, %v770_v3  ;;  %v776_v11 = vpop.permute.xlu1 %775 }
  0x9b   :  { %vm782_vm2 = vcmp.eq.s32.totalorder %v1470_v5, %v776_v11 }
  0x9e   :  { %v594_v22 = vpop.f32.mrf.mxu0 }
  0x9f   :  { %v613_v14 = vpop.f32.mrf.mxu1 }
  0xa0   :  { %v614_v31 = vadd.f32 %v613_v14, %v594_v22 }
  0xa1   :  { %v773_v10 = vpop.permute.xlu0 %772 }
  0xa2   :  { %vm781_vm1 = vcmp.eq.s32.totalorder %v1470_v5, %v773_v10  ;;  %v779_v13 = vpop.permute.xlu1 %778 }
  0xa3   :  { %vm783_vm3 = vcmp.eq.s32.totalorder %v1470_v5, %v779_v13 }
  0xa6   :  { %v632_v53 = vpop.f32.mrf.mxu2  ;;  %v596_v59 = vpop.f32.mrf.mxu0 }
  0xa7   :  { %v615_v19 = vpop.f32.mrf.mxu1  ;;  %v651_v24 = vpop.f32.mrf.mxu3  ;;  %v633_v23 = vadd.f32 %v632_v53, %v614_v31  ;;  %v1157_v31 = vmov 0.0  }
  0xa8   :  { %v616_v41 = vadd.f32 %v615_v19, %v596_v59 }
  0xa9   :  { %v652_v33 = vadd.f32 %v651_v24, %v633_v23 }
  0xae   :  { %v634_v25 = vpop.f32.mrf.mxu2  ;;  %v599_v26 = vpop.f32.mrf.mxu0 }
  0xaf   :  { %v618_v27 = vpop.f32.mrf.mxu1  ;;  %v653_v28 = vpop.f32.mrf.mxu3  ;;  %v635_v46 = vadd.f32 %v634_v25, %v616_v41 }
  0xb0   :  { %v619_v35 = vadd.f32 %v618_v27, %v599_v26 }
  0xb1   :  { %v654_v32 = vadd.f32 %v653_v28, %v635_v46 }
  0xb6   :  { %v637_v4 = vpop.f32.mrf.mxu2  ;;  %v601_v29 = vpop.f32.mrf.mxu0 }
  0xb7   :  { %v620_v30 = vpop.f32.mrf.mxu1  ;;  %v656_v9 = vpop.f32.mrf.mxu3  ;;  %v638_v45 = vadd.f32 %v637_v4, %v619_v35 }
  0xb8   :  { %v621_v52 = vadd.f32 %v620_v30, %v601_v29 }
  0xb9   :  { %v657_v49 = vadd.f32 %v656_v9, %v638_v45 }
  0xbe   :  { %v639_v34 = vpop.f32.mrf.mxu2  ;;  %v670_v38 = vpop.f32.mrf.mxu0 }
  0xbf   :  { %v689_v40 = vpop.f32.mrf.mxu1  ;;  %v658_v42 = vpop.f32.mrf.mxu3  ;;  %v671_v43 = vadd.f32 %v670_v38, %v652_v33  ;;  %v640_v20 = vadd.f32 %v639_v34, %v621_v52 }
  0xc1   :  { %v690_v47 = vadd.f32 %v689_v40, %v671_v43  ;;  %v659_v2 = vadd.f32 %v658_v42, %v640_v20 }
  0xc3   :  { %v1464_v48 = vadd.f32 %v1139_v44, %v690_v47 }
  0xc5   :  { %726 = vmax.xlane.f32.xlu2 %v1464_v48  ;;  %v784_v39 = vsel %vm780_vm0, %v1464_v48, -1e+30 }
  0xc6   :  { %v675_v51 = vpop.f32.mrf.mxu2  ;;  %v672_v55 = vpop.f32.mrf.mxu0 }
  0xc7   :  { %v676_v54 = vadd.f32 %v675_v51, %v657_v49  ;;  %v673_v56 = vadd.f32 %v672_v55, %v654_v32  ;;  %v694_v57 = vpop.f32.mrf.mxu3  ;;  %v691_v58 = vpop.f32.mrf.mxu1 }
  0xc9   :  { %v695_v60 = vadd.f32 %v694_v57, %v676_v54  ;;  %v692_v62 = vadd.f32 %v691_v58, %v673_v56 }
  0xcb   :  { %v1467_v0 = vadd.f32 %v1139_v44, %v695_v60  ;;  %v719_v1 = vadd.f32 %v1139_v44, %v692_v62 }
  0xcd   :  { %730 = vmax.xlane.f32.xlu0 %v1467_v0  ;;  %728 = vmax.xlane.f32.xlu2 %v719_v1  ;;  %v785_v12 = vsel %vm781_vm1, %v719_v1, -1e+30  ;;  %v786_v50 = vsel %vm782_vm2, %v1467_v0, -1e+30 }
  0xce   :  { %v677_v6 = vpop.f32.mrf.mxu2 }
  0xcf   :  { %v678_v7 = vadd.f32 %v677_v6, %v659_v2  ;;  %v696_v36 = vpop.f32.mrf.mxu3 }
  0xd1   :  { %v697_v37 = vadd.f32 %v696_v36, %v678_v7 }
  0xd3   :  { %v721_v8 = vadd.f32 %v1139_v44, %v697_v37 }
  0xd5   :  { %732 = vmax.xlane.f32.xlu1 %v721_v8  ;;  %788 = vmax.xlane.f32.xlu2 %v784_v39  ;;  %v787_v15 = vsel %vm783_vm3, %v721_v8, -1e+30 }
  0xdd   :  { %790 = vmax.xlane.f32.xlu2 %v785_v12 }
  0xe5   :  { %792 = vmax.xlane.f32.xlu2 %v786_v50 }
  0xed   :  { %794 = vmax.xlane.f32.xlu2 %v787_v15 }
 0x138   :  { %v727_v16 = vpop.xlane.xlu2 %726 }
 0x139   :  { %v734_v17 = vsub.f32 %v1464_v48, %v727_v16 }
 0x13b   :  { %v738_v18 = vmul.f32 1.442695, %v734_v17 }
 0x13d   :  { %1140 = vpow2.f32 %v738_v18 }
 0x140   :  { %v1479_v21 = vpop.xlane.xlu0 %730  ;;  %v729_v22 = vpop.xlane.xlu2 %728 }
 0x141   :  { %v736_v63 = vsub.f32 %v1467_v0, %v1479_v21  ;;  %v735_v14 = vsub.f32 %v719_v1, %v729_v22 }
 0x143   :  { %v742_v53 = vmul.f32 1.442695, %v736_v63  ;;  %v1141_v59 = vpop.eup %1140  ;;  %v740_v19 = vmul.f32 1.442695, %v735_v14 }
 0x144   :  { %746 = vadd.xlane.f32.xlu2 %v1141_v59 }
 0x145   :  { %1142 = vpow2.f32 %v742_v53 }
 0x146   :  { %1144 = vpow2.f32 %v740_v19 }
 0x148   :  { %v1483_v24 = vpop.xlane.xlu1 %732  ;;  %v1486_v26 = vpop.xlane.xlu2 %788 }
 0x149   :  { %v737_v25 = vsub.f32 %v721_v8, %v1483_v24  ;;  %vm800_vm4 = vcmp.gt.f32.partialorder %v1464_v48, %v1486_v26 }
 0x14a   :  { %v1059_v23 = vsel %vm800_vm4, 1.0, %v1157_v31 }
 0x14b   :  { %v1143_v27 = vpop.eup %1142  ;;  %v744_v28 = vmul.f32 1.442695, %v737_v25 }
 0x14c   :  { %v1145_v4 = vpop.eup %1144  ;;  %750 = vadd.xlane.f32.xlu0 %v1143_v27 }
 0x14d   :  { %1146 = vpow2.f32 %v744_v28  ;;  %748 = vadd.xlane.f32.xlu2 %v1145_v4 }
 0x150   :  { %v791_v29 = vpop.xlane.xlu2 %790 }
 0x151   :  { %vm801_vm5 = vcmp.gt.f32.partialorder %v719_v1, %v791_v29 }
 0x152   :  { %v1060_v9 = vsel %vm801_vm5, 1.0, %v1157_v31 }
 0x153   :  { %v1147_v30 = vpop.eup %1146 }
 0x154   :  { %752 = vadd.xlane.f32.xlu1 %v1147_v30  ;;  %814 = vadd.xlane.f32.xlu0 %v1060_v9 }
 0x155   :  { %812 = vadd.xlane.f32.xlu2 %v1059_v23 }
 0x158   :  { %v793_v33 = vpop.xlane.xlu2 %792 }
 0x159   :  { %vm802_vm6 = vcmp.gt.f32.partialorder %v1467_v0, %v793_v33 }
 0x15a   :  { %v1061_v34 = vsel %vm802_vm6, 1.0, %v1157_v31 }
 0x15c   :  { %816 = vadd.xlane.f32.xlu1 %v1061_v34 }
 0x160   :  { %v1494_v35 = vpop.xlane.xlu2 %794 }
 0x161   :  { %vm803_vm7 = vcmp.gt.f32.partialorder %v721_v8, %v1494_v35 }
 0x162   :  { %v1062_v38 = vsel %vm803_vm7, 1.0, %v1157_v31 }
 0x163   :  { %818 = vadd.xlane.f32.xlu2 %v1062_v38 }
 0x1b7   :  { %v747_v40 = vpop.xlane.xlu2 %746 }
 0x1b8   :  { %1148 = vlog2.f32 %v747_v40 }
 0x1be   :  { %v1149_v42 = vpop.eup %1148 }
 0x1bf   :  { %v751_v41 = vpop.xlane.xlu0 %750  ;;  %v755_v44 = vmul.f32 0.6931472, %v1149_v42 }
 0x1c0   :  { %1150 = vlog2.f32 %v751_v41  ;;  %v749_v43 = vpop.xlane.xlu2 %748 }
 0x1c1   :  { %1152 = vlog2.f32 %v749_v43  ;;  %v762_v47 = vadd.f32 %v755_v44, %v727_v16 }
 0x1c3   :  { %v796_v60 = vsub.f32 %v762_v47, %v1486_v26 }
 0x1c6   :  { %v1151_v45 = vpop.eup %1150 }
 0x1c7   :  { %v1153_v46 = vpop.eup %1152  ;;  %v753_v48 = vpop.xlane.xlu1 %752  ;;  %v759_v32 = vmul.f32 0.6931472, %v1151_v45 }
 0x1c8   :  { %v815_v49 = vpop.xlane.xlu0 %814  ;;  %v757_v51 = vmul.f32 0.6931472, %v1153_v46  ;;  %v813_v52 = vpop.xlane.xlu2 %812  ;;  %1154 = vlog2.f32 %v753_v48 }
 0x1c9   :  { %vm821_vm10 = vcmp.lt.f32.partialorder %v815_v49, 1.0  ;;  %vm833_vm11 = vcmp.lt.f32.partialorder %v815_v49, 5.0  ;;  %vm820_vm12 = vcmp.lt.f32.partialorder %v813_v52, 1.0  ;;  %vm832_vm13 = vcmp.lt.f32.partialorder %v813_v52, 5.0 }
 0x1ca   :  { %v1064_v54 = vsel %vm821_vm10, 1.0, %v1157_v31  ;;  %v1068_v55 = vsel %vm833_vm11, 1.0, %v1157_v31  ;;  %v763_v56 = vadd.f32 %v757_v51, %v729_v22  ;;  %v1063_v20 = vsel %vm820_vm12, 1.0, %v1157_v31 }
 0x1cb   :  { %v848_v57 = vsel %vm846_vm9, %v1068_v55, 0.0  ;;  %v1067_v58 = vsel %vm832_vm13, 1.0, %v1157_v31  ;;  %v764_v2 = vadd.f32 %v759_v32, %v1479_v21 }
 0x1cc   :  { %v797_v61 = vsub.f32 %v763_v56, %v791_v29  ;;  %v847_v62 = vsel %vm846_vm9, %v1067_v58, 0.0  ;;  %v852_v0 = vsel %vm845_vm8, %v1064_v54, %v848_v57 }
 0x1cd   :  { %v851_v1 = vsel %vm845_vm8, %v1063_v20, %v847_v62  ;;  %v798_v39 = vsub.f32 %v764_v2, %v793_v33 }
 0x1ce   :  { %v856_v3 = vsel %vm844_vm14, %v797_v61, %v852_v0  ;;  %v855_v6 = vsel %vm844_vm14, %v796_v60, %v851_v1  ;;  %v1155_v7 = vpop.eup %1154 }
 0x1cf   :  { %860 = vst [vmem:[%s1555_s6 + $0x8] sm:$0xff] %v856_v3  ;;  %v817_v36 = vpop.xlane.xlu1 %816  ;;  %v761_v10 = vmul.f32 0.6931472, %v1155_v7 }
 0x1d0   :  { %859 = vst [vmem:[%s1555_s6] sm:$0xff] %v855_v6  ;;  %vm822_vm15 = vcmp.lt.f32.partialorder %v817_v36, 1.0  ;;  %vm834_vm0 = vcmp.lt.f32.partialorder %v817_v36, 5.0 }
 0x1d1   :  { %v1065_v37 = vsel %vm822_vm15, 1.0, %v1157_v31  ;;  %v1069_v8 = vsel %vm834_vm0, 1.0, %v1157_v31  ;;  %v765_v13 = vadd.f32 %v761_v10, %v1483_v24 }
 0x1d2   :  { %v849_v11 = vsel %vm846_vm9, %v1069_v8, 0.0 }
 0x1d3   :  { %v853_v12 = vsel %vm845_vm8, %v1065_v37, %v849_v11  ;;  %v799_v18 = vsub.f32 %v765_v13, %v1494_v35 }
 0x1d4   :  { %v857_v50 = vsel %vm844_vm14, %v798_v39, %v853_v12 }
 0x1d5   :  { %861 = vst [vmem:[%s1555_s6 + $0x10] sm:$0xff] %v857_v50 }
 0x1d6   :  { %v819_v15 = vpop.xlane.xlu2 %818 }
 0x1d7   :  { %vm823_vm1 = vcmp.lt.f32.partialorder %v819_v15, 1.0  ;;  %vm835_vm2 = vcmp.lt.f32.partialorder %v819_v15, 5.0 }
 0x1d8   :  { %v1066_v16 = vsel %vm823_vm1, 1.0, %v1157_v31  ;;  %v1070_v17 = vsel %vm835_vm2, 1.0, %v1157_v31 }
 0x1d9   :  { %v850_v21 = vsel %vm846_vm9, %v1070_v17, 0.0 }
 0x1da   :  { %v854_v63 = vsel %vm845_vm8, %v1066_v16, %v850_v21 }
 0x1db   :  { %v858_v22 = vsel %vm844_vm14, %v799_v18, %v854_v63 }
 0x1dc   :  { %862 = vst [vmem:[%s1555_s6 + $0x18] sm:$0xff] %v858_v22 }

</bundles_post_ra>
